<compile_context>
chip_gen: v7x
topology: tpu7x:2x2x1
jax: 0.10.0
libtpu: 0.0.40
codegen_flags: <defaults>
</compile_context>

<pallas_src>
import jax
import jax.numpy as jnp
from jax.experimental import pallas as pl
from jax.experimental.pallas import tpu as pltpu

_LN_EPS = 1e-5
_INV_SQRT2 = 0.7071067811865476


def _layernorm(x, g, b):
    mu = jnp.mean(x, axis=-1, keepdims=True)
    var = jnp.mean((x - mu) ** 2, axis=-1, keepdims=True)
    return (x - mu) * jax.lax.rsqrt(var + _LN_EPS) * g + b


def _gelu(x):
    # exact (erf-based) GELU, matching torch.nn.GELU() default
    return 0.5 * x * (1.0 + jax.lax.erf(x * _INV_SQRT2))


def _log_softmax(x):
    m = jnp.max(x, axis=-1, keepdims=True)
    s = x - m
    return s - jnp.log(jnp.sum(jnp.exp(s), axis=-1, keepdims=True))


def _softmax(x):  # reference only
    m = jnp.max(x, axis=-1, keepdims=True)
    e = jnp.exp(x - m)
    return e / jnp.sum(e, axis=-1, keepdims=True)


# Single kernel invocation. Rows of x_ref are interleaved as r = n*B + b.
# w_ref: packed weight slab (5.75*C rows, 2*C cols).
# v_ref: packed vector slab (12 rows, 2*C cols) of LN params / biases.
def mask_predictor_kernel(x_ref, pol_ref, qm_ref, w_ref, v_ref, out_ref):
    NB, C = x_ref.shape
    B = qm_ref.shape[0]
    half = C // 2
    quarter = C // 4
    f32 = jnp.float32

    x = x_ref[...]            # (NB, C)
    pol = pol_ref[...]        # (NB, 1)
    qm = qm_ref[...]          # (B, C)   per-batch query mean
    w = w_ref[...]            # (5.75*C, 2*C)
    v = v_ref[...]            # (12, 2*C)

    # ---- carve packed parameter slabs (static slices, zero-cost) ----
    w1 = w[0:C, 0:C]
    wq1 = w[C:2 * C, 0:2 * C]
    wq2 = w[2 * C:4 * C, 0:C]
    wo1 = w[4 * C:5 * C, 0:half]
    wo2 = w[5 * C:5 * C + half, 0:quarter]
    wo3d = w[5 * C + half:5 * C + half + quarter, 0:1]

    ln1_g, ln1_b, b1 = v[0:1, 0:C], v[1:2, 0:C], v[2:3, 0:C]
    lnq_g, lnq_b = v[3:4, 0:C], v[4:5, 0:C]
    bq1, bq2 = v[5:6, 0:2 * C], v[6:7, 0:C]
    lno_g, lno_b = v[7:8, 0:C], v[8:9, 0:C]
    bo1, bo2, bo3d = v[9:10, 0:half], v[10:11, 0:quarter], v[11:12, 0:1]

    # ---- in-kernel 0/1 selection matrices: row r belongs to batch r % B ----
    sel_bt = ((jax.lax.broadcasted_iota(jnp.int32, (B, NB), 1) % B)
              == jax.lax.broadcasted_iota(jnp.int32, (B, NB), 0)).astype(f32)
    sel_tb = ((jax.lax.broadcasted_iota(jnp.int32, (NB, B), 0) % B)
              == jax.lax.broadcasted_iota(jnp.int32, (NB, B), 1)).astype(f32)

    # ---- in_conv: LayerNorm -> Linear(C, C) -> GELU ----
    h = _layernorm(x, ln1_g, ln1_b)
    h = _gelu(jnp.dot(h, w1, preferred_element_type=f32) + b1)

    # ---- policy-pooled per-batch global features (clamped denominator) ----
    den = jnp.dot(sel_bt, pol, preferred_element_type=f32)            # (B, 1)
    inv_den = pl.reciprocal(jnp.maximum(den, 1e-6), approx=False)     # (B, 1)
    g_pb = jnp.dot(sel_bt, h * pol, preferred_element_type=f32) * inv_den  # (B, C)

    # ---- query_conv on the per-batch query mean (B-row matmuls) ----
    qh = _layernorm(qm, lnq_g, lnq_b)
    qh = _gelu(jnp.dot(qh, wq1, preferred_element_type=f32) + bq1)
    qh = jnp.dot(qh, wq2, preferred_element_type=f32) + bq2
    qq = _log_softmax(qh)                                             # (B, C)

    # ---- merged per-batch map + single broadcast matmul + lane select ----
    lane_b = jax.lax.broadcasted_iota(jnp.int32, (B, C), 1)
    m_pb = jnp.where(lane_b < half, qq, g_pb * qq)                    # (B, C)
    m_rows = jnp.dot(sel_tb, m_pb, preferred_element_type=f32)        # (NB, C)
    lane = jax.lax.broadcasted_iota(jnp.int32, (NB, C), 1)
    xm = jnp.where(lane < half, h, 1.0) * m_rows                      # (NB, C)

    # ---- out_conv: LN -> Lin(C,C/2) -> GELU -> Lin(C/2,C/4) -> GELU ----
    o = _layernorm(xm, lno_g, lno_b)
    o = _gelu(jnp.dot(o, wo1, preferred_element_type=f32) + bo1)
    o = _gelu(jnp.dot(o, wo2, preferred_element_type=f32) + bo2)

    # softmax over 2 classes == sigmoid of the logit difference; emit p0 only.
    d = jnp.dot(o, wo3d, preferred_element_type=f32) + bo3d           # (NB, 1)
    out_ref[...] = pl.reciprocal(1.0 + jnp.exp(-d), approx=False)


def _forward_impl(x_nbc, query_nbc, policy, params):
    """x_nbc: (N, B, C), query_nbc: (Nq, B, C), policy: (B, N, 1) -> (B, N, 2)."""
    N, B, C = x_nbc.shape
    NB = N * B
    f32 = jnp.float32
    W2 = 2 * C

    # Native-layout flattening: row r = n*B + b (metadata reshape, no transpose of x).
    x2d = x_nbc.astype(f32).reshape(NB, C)
    pol_rows = jnp.transpose(policy.astype(f32), (1, 0, 2)).reshape(NB, 1)
    # Hoisted query mean: the Nq-long query slab never enters the kernel.
    qm = jnp.mean(query_nbc.astype(f32), axis=0)                      # (B, C)

    # Collapse Linear(C/4, 2) + Softmax(2) into a single logit-difference column.
    wo3d = params["wo3"][:, 0:1] - params["wo3"][:, 1:2]              # (C//4, 1)
    bo3d = params["bo3"][:, 0:1] - params["bo3"][:, 1:2]              # (1, 1)

    def pad(a):  # pad columns to the slab width (2*C)
        return jnp.pad(a.astype(f32), ((0, 0), (0, W2 - a.shape[1])))

    # Two contiguous parameter slabs -> 2 DMAs instead of ~18.
    w_slab = jnp.concatenate(
        [pad(params["w1"]), pad(params["wq1"]), pad(params["wq2"]),
         pad(params["wo1"]), pad(params["wo2"]), pad(wo3d)], axis=0)   # (5.75C, 2C)
    v_slab = jnp.concatenate(
        [pad(params["ln1_g"]), pad(params["ln1_b"]), pad(params["b1"]),
         pad(params["lnq_g"]), pad(params["lnq_b"]), pad(params["bq1"]),
         pad(params["bq2"]),
         pad(params["lno_g"]), pad(params["lno_b"]), pad(params["bo1"]),
         pad(params["bo2"]), pad(bo3d)], axis=0)                       # (12, 2C)

    p0_rows = pl.pallas_call(
        mask_predictor_kernel,
        out_shape=jax.ShapeDtypeStruct((NB, 1), f32),
        compiler_params=pltpu.CompilerParams(vmem_limit_bytes=32 * 1024 * 1024),
    )(x2d, pol_rows, qm, w_slab, v_slab)

    # rows are (n, b)-ordered -> (B, N); assemble [p0, 1-p0] in the fused epilogue.
    p0 = jnp.transpose(p0_rows.reshape(N, B), (1, 0))                  # (B, N)
    return jnp.stack([p0, 1.0 - p0], axis=-1)                          # (B, N, 2)


mask_predictor_forward = jax.jit(_forward_impl)


def init_params(key, C):
    """Deterministic synthetic parameters (PyTorch-Linear-style uniform init)."""
    def lin(k, fan_in, fan_out):
        lim = 1.0 / (fan_in ** 0.5)
        kw, kb = jax.random.split(k)
        W = jax.random.uniform(kw, (fan_in, fan_out), jnp.float32, -lim, lim)
        b = jax.random.uniform(kb, (1, fan_out), jnp.float32, -lim, lim)
        return W, b

    ks = jax.random.split(key, 8)
    p = {}
    # in_conv
    p["ln1_g"] = jnp.ones((1, C), jnp.float32)
    p["ln1_b"] = jnp.zeros((1, C), jnp.float32)
    p["w1"], p["b1"] = lin(ks[0], C, C)
    # query_conv
    p["lnq_g"] = jnp.ones((1, C), jnp.float32)
    p["lnq_b"] = jnp.zeros((1, C), jnp.float32)
    p["wq1"], p["bq1"] = lin(ks[1], C, 2 * C)
    p["wq2"], p["bq2"] = lin(ks[2], 2 * C, C)
    # out_conv
    p["lno_g"] = jnp.ones((1, C), jnp.float32)
    p["lno_b"] = jnp.zeros((1, C), jnp.float32)
    p["wo1"], p["bo1"] = lin(ks[3], C, C // 2)
    p["wo2"], p["bo2"] = lin(ks[4], C // 2, C // 4)
    p["wo3"], p["bo3"] = lin(ks[5], C // 4, 2)
    return p


def reference_forward(x_nbc, query_nbc, policy, p):
    """Pure-JAX reference reproducing the PyTorch forward (for validation)."""
    x = jnp.transpose(x_nbc, (1, 0, 2)).astype(jnp.float32)
    q = jnp.transpose(query_nbc, (1, 0, 2)).astype(jnp.float32)
    pol = policy.astype(jnp.float32)
    B, N, C = x.shape
    half = C // 2

    h = _layernorm(x, p["ln1_g"], p["ln1_b"])
    h = _gelu(h @ p["w1"] + p["b1"])
    local_x = h[:, :, :half]
    global_x = jnp.sum(h[:, :, half:] * pol, axis=1, keepdims=True) / jnp.sum(
        pol, axis=1, keepdims=True)
    xc = jnp.concatenate(
        [local_x, jnp.broadcast_to(global_x, (B, N, half))], axis=-1)

    qm = jnp.mean(q, axis=1, keepdims=True)
    qh = _layernorm(qm, p["lnq_g"], p["lnq_b"])
    qh = _gelu(qh @ p["wq1"] + p["bq1"])
    qq = _log_softmax(qh @ p["wq2"] + p["bq2"])

    xm = xc * qq
    oh = _layernorm(xm, p["lno_g"], p["lno_b"])
    oh = _gelu(oh @ p["wo1"] + p["bo1"])
    oh = _gelu(oh @ p["wo2"] + p["bo2"])
    oh = oh @ p["wo3"] + p["bo3"]
    return _softmax(oh)


if __name__ == "__main__":
    C = 32     # embed_dim
    N = 8      # x sequence length
    Nq = 8     # query sequence length
    B = 2      # batch

    key = jax.random.PRNGKey(0)
    kx, kq, kp, kw = jax.random.split(key, 4)

    x = jax.random.normal(kx, (N, B, C), jnp.float32)       # (N, B, C)
    query = jax.random.normal(kq, (Nq, B, C), jnp.float32)  # (Nq, B, C)
    policy = (jax.random.uniform(kp, (B, N, 1)) > 0.5).astype(jnp.float32)
    policy = policy.at[:, 0, :].set(1.0)                    # guard against /0

    params = init_params(kw, C)

    out = mask_predictor_forward(x, query, policy, params)
    out = jax.block_until_ready(out)

    ref = reference_forward(x, query, policy, params)
    assert out.shape == (B, N, 2)
    assert jnp.allclose(out, ref, atol=2e-5, rtol=1e-4), (
        f"max abs err {jnp.max(jnp.abs(out - ref))}")

    print("KERNEL_OK")
</pallas_src>

<mosaic_0001>
module attributes {stable_mosaic.version = 11 : i64} {
  func.func @mask_predictor_kernel(%arg0: memref<16x32xf32, #tpu.memory_space<vmem>>, %arg1: memref<16x1xf32, #tpu.memory_space<vmem>>, %arg2: memref<2x32xf32, #tpu.memory_space<vmem>>, %arg3: memref<184x64xf32, #tpu.memory_space<vmem>>, %arg4: memref<12x64xf32, #tpu.memory_space<vmem>>, %arg5: memref<16x1xf32, #tpu.memory_space<vmem>>) attributes {dimension_semantics = [], scalar_prefetch = 0 : i64, scratch_operands = 0 : i64, tpu.core_type = #tpu.core_type<tc>} {
    %c0 = arith.constant 0 : index
    %c0_0 = arith.constant 0 : index
    %0 = vector.load %arg0[%c0, %c0_0] : memref<16x32xf32, #tpu.memory_space<vmem>>, vector<16x32xf32>
    %c0_1 = arith.constant 0 : index
    %c0_2 = arith.constant 0 : index
    %1 = vector.load %arg1[%c0_1, %c0_2] : memref<16x1xf32, #tpu.memory_space<vmem>>, vector<16x1xf32>
    %c0_3 = arith.constant 0 : index
    %c0_4 = arith.constant 0 : index
    %2 = vector.load %arg2[%c0_3, %c0_4] : memref<2x32xf32, #tpu.memory_space<vmem>>, vector<2x32xf32>
    %c0_5 = arith.constant 0 : index
    %c0_6 = arith.constant 0 : index
    %3 = vector.load %arg3[%c0_5, %c0_6] : memref<184x64xf32, #tpu.memory_space<vmem>>, vector<184x64xf32>
    %c0_7 = arith.constant 0 : index
    %c0_8 = arith.constant 0 : index
    %4 = vector.load %arg4[%c0_7, %c0_8] : memref<12x64xf32, #tpu.memory_space<vmem>>, vector<12x64xf32>
    %5 = vector.extract_strided_slice %3 {offsets = [0, 0], sizes = [32, 32], strides = [1, 1]} : vector<184x64xf32> to vector<32x32xf32>
    %6 = vector.extract_strided_slice %3 {offsets = [32, 0], sizes = [32, 64], strides = [1, 1]} : vector<184x64xf32> to vector<32x64xf32>
    %7 = vector.extract_strided_slice %3 {offsets = [64, 0], sizes = [64, 32], strides = [1, 1]} : vector<184x64xf32> to vector<64x32xf32>
    %8 = vector.extract_strided_slice %3 {offsets = [128, 0], sizes = [32, 16], strides = [1, 1]} : vector<184x64xf32> to vector<32x16xf32>
    %9 = vector.extract_strided_slice %3 {offsets = [160, 0], sizes = [16, 8], strides = [1, 1]} : vector<184x64xf32> to vector<16x8xf32>
    %10 = vector.extract_strided_slice %3 {offsets = [176, 0], sizes = [8, 1], strides = [1, 1]} : vector<184x64xf32> to vector<8x1xf32>
    %11 = vector.extract_strided_slice %4 {offsets = [0, 0], sizes = [1, 32], strides = [1, 1]} : vector<12x64xf32> to vector<1x32xf32>
    %12 = vector.extract_strided_slice %4 {offsets = [1, 0], sizes = [1, 32], strides = [1, 1]} : vector<12x64xf32> to vector<1x32xf32>
    %13 = vector.extract_strided_slice %4 {offsets = [2, 0], sizes = [1, 32], strides = [1, 1]} : vector<12x64xf32> to vector<1x32xf32>
    %14 = vector.extract_strided_slice %4 {offsets = [3, 0], sizes = [1, 32], strides = [1, 1]} : vector<12x64xf32> to vector<1x32xf32>
    %15 = vector.extract_strided_slice %4 {offsets = [4, 0], sizes = [1, 32], strides = [1, 1]} : vector<12x64xf32> to vector<1x32xf32>
    %16 = vector.extract_strided_slice %4 {offsets = [5, 0], sizes = [1, 64], strides = [1, 1]} : vector<12x64xf32> to vector<1x64xf32>
    %17 = vector.extract_strided_slice %4 {offsets = [6, 0], sizes = [1, 32], strides = [1, 1]} : vector<12x64xf32> to vector<1x32xf32>
    %18 = vector.extract_strided_slice %4 {offsets = [7, 0], sizes = [1, 32], strides = [1, 1]} : vector<12x64xf32> to vector<1x32xf32>
    %19 = vector.extract_strided_slice %4 {offsets = [8, 0], sizes = [1, 32], strides = [1, 1]} : vector<12x64xf32> to vector<1x32xf32>
    %20 = vector.extract_strided_slice %4 {offsets = [9, 0], sizes = [1, 16], strides = [1, 1]} : vector<12x64xf32> to vector<1x16xf32>
    %21 = vector.extract_strided_slice %4 {offsets = [10, 0], sizes = [1, 8], strides = [1, 1]} : vector<12x64xf32> to vector<1x8xf32>
    %22 = vector.extract_strided_slice %4 {offsets = [11, 0], sizes = [1, 1], strides = [1, 1]} : vector<12x64xf32> to vector<1x1xf32>
    %23 = tpu.iota {dimensions = array<i32: 1>} : vector<2x16xi32>
    %c2_i32 = arith.constant 2 : i32
    %c0_i32 = arith.constant 0 : i32
    %24 = arith.cmpi eq, %c2_i32, %c0_i32 : i32
    %c1_i32 = arith.constant 1 : i32
    %25 = arith.select %24, %c1_i32, %c2_i32 : i32
    %26 = vector.broadcast %25 : i32 to vector<2x16xi32>
    %27 = arith.remsi %23, %26 : vector<2x16xi32>
    %c0_i32_9 = arith.constant 0 : i32
    %28 = vector.broadcast %c0_i32_9 : i32 to vector<2x16xi32>
    %29 = arith.cmpi ne, %27, %28 : vector<2x16xi32>
    %c0_i32_10 = arith.constant 0 : i32
    %30 = vector.broadcast %c0_i32_10 : i32 to vector<2x16xi32>
    %31 = arith.cmpi slt, %27, %30 : vector<2x16xi32>
    %c0_i32_11 = arith.constant 0 : i32
    %32 = arith.cmpi slt, %25, %c0_i32_11 : i32
    %33 = vector.broadcast %32 : i1 to vector<2x16xi1>
    %34 = vector.broadcast %33 : vector<2x16xi1> to vector<2x16xi1>
    %35 = arith.xori %31, %34 : vector<2x16xi1>
    %36 = arith.andi %35, %29 : vector<2x16xi1>
    %37 = vector.broadcast %25 : i32 to vector<2x16xi32>
    %38 = arith.addi %27, %37 : vector<2x16xi32>
    %39 = arith.select %36, %38, %27 : vector<2x16xi1>, vector<2x16xi32>
    %40 = tpu.iota {dimensions = array<i32: 0>} : vector<2x16xi32>
    %41 = arith.cmpi eq, %39, %40 : vector<2x16xi32>
    %42 = arith.extui %41 : vector<2x16xi1> to vector<2x16xi32>
    %43 = arith.sitofp %42 : vector<2x16xi32> to vector<2x16xf32>
    %44 = tpu.iota {dimensions = array<i32: 0>} : vector<16x2xi32>
    %c2_i32_12 = arith.constant 2 : i32
    %c0_i32_13 = arith.constant 0 : i32
    %45 = arith.cmpi eq, %c2_i32_12, %c0_i32_13 : i32
    %c1_i32_14 = arith.constant 1 : i32
    %46 = arith.select %45, %c1_i32_14, %c2_i32_12 : i32
    %47 = vector.broadcast %46 : i32 to vector<16x2xi32>
    %48 = arith.remsi %44, %47 : vector<16x2xi32>
    %c0_i32_15 = arith.constant 0 : i32
    %49 = vector.broadcast %c0_i32_15 : i32 to vector<16x2xi32>
    %50 = arith.cmpi ne, %48, %49 : vector<16x2xi32>
    %c0_i32_16 = arith.constant 0 : i32
    %51 = vector.broadcast %c0_i32_16 : i32 to vector<16x2xi32>
    %52 = arith.cmpi slt, %48, %51 : vector<16x2xi32>
    %c0_i32_17 = arith.constant 0 : i32
    %53 = arith.cmpi slt, %46, %c0_i32_17 : i32
    %54 = vector.broadcast %53 : i1 to vector<16x2xi1>
    %55 = vector.broadcast %54 : vector<16x2xi1> to vector<16x2xi1>
    %56 = arith.xori %52, %55 : vector<16x2xi1>
    %57 = arith.andi %56, %50 : vector<16x2xi1>
    %58 = vector.broadcast %46 : i32 to vector<16x2xi32>
    %59 = arith.addi %48, %58 : vector<16x2xi32>
    %60 = arith.select %57, %59, %48 : vector<16x2xi1>, vector<16x2xi32>
    %61 = tpu.iota {dimensions = array<i32: 1>} : vector<16x2xi32>
    %62 = arith.cmpi eq, %60, %61 : vector<16x2xi32>
    %63 = arith.extui %62 : vector<16x2xi1> to vector<16x2xi32>
    %64 = arith.sitofp %63 : vector<16x2xi32> to vector<16x2xf32>
    %cst = arith.constant dense<0.000000e+00> : vector<16xf32>
    %65 = vector.multi_reduction <add>, %0, %cst [1] : vector<16x32xf32> to vector<16xf32>
    %66 = vector.shape_cast %65 : vector<16xf32> to vector<16x1xf32>
    %cst_18 = arith.constant 3.200000e+01 : f32
    %67 = vector.broadcast %cst_18 : f32 to vector<16x1xf32>
    %68 = arith.divf %66, %67 : vector<16x1xf32>
    %69 = vector.broadcast %68 : vector<16x1xf32> to vector<16x32xf32>
    %70 = arith.subf %0, %69 : vector<16x32xf32>
    %71 = arith.mulf %70, %70 : vector<16x32xf32>
    %cst_19 = arith.constant dense<0.000000e+00> : vector<16xf32>
    %72 = vector.multi_reduction <add>, %71, %cst_19 [1] : vector<16x32xf32> to vector<16xf32>
    %73 = vector.shape_cast %72 : vector<16xf32> to vector<16x1xf32>
    %cst_20 = arith.constant 3.200000e+01 : f32
    %74 = vector.broadcast %cst_20 : f32 to vector<16x1xf32>
    %75 = arith.divf %73, %74 : vector<16x1xf32>
    %76 = vector.broadcast %68 : vector<16x1xf32> to vector<16x32xf32>
    %77 = arith.subf %0, %76 : vector<16x32xf32>
    %cst_21 = arith.constant 9.99999974E-6 : f32
    %78 = vector.broadcast %cst_21 : f32 to vector<16x1xf32>
    %79 = arith.addf %75, %78 : vector<16x1xf32>
    %80 = math.rsqrt %79 : vector<16x1xf32>
    %81 = vector.broadcast %80 : vector<16x1xf32> to vector<16x32xf32>
    %82 = arith.mulf %77, %81 : vector<16x32xf32>
    %83 = vector.broadcast %11 : vector<1x32xf32> to vector<16x32xf32>
    %84 = arith.mulf %82, %83 : vector<16x32xf32>
    %85 = vector.broadcast %12 : vector<1x32xf32> to vector<16x32xf32>
    %86 = arith.addf %84, %85 : vector<16x32xf32>
    %cst_22 = arith.constant dense<0.000000e+00> : vector<16x32xf32>
    %87 = tpu.matmul %86, %5, %cst_22 {dimension_numbers = #tpu.dot_dimension_numbers<[1], [0], [0], [1], [0, 0, 1, 1], [], []>} : vector<16x32xf32>, vector<32x32xf32>, vector<16x32xf32> -> vector<16x32xf32>
    %88 = vector.broadcast %13 : vector<1x32xf32> to vector<16x32xf32>
    %89 = arith.addf %87, %88 : vector<16x32xf32>
    %cst_23 = arith.constant 5.000000e-01 : f32
    %90 = vector.broadcast %cst_23 : f32 to vector<16x32xf32>
    %91 = arith.mulf %90, %89 : vector<16x32xf32>
    %cst_24 = arith.constant 0.707106769 : f32
    %92 = vector.broadcast %cst_24 : f32 to vector<16x32xf32>
    %93 = arith.mulf %89, %92 : vector<16x32xf32>
    %94 = math.erf %93 : vector<16x32xf32>
    %cst_25 = arith.constant 1.000000e+00 : f32
    %95 = vector.broadcast %cst_25 : f32 to vector<16x32xf32>
    %96 = arith.addf %95, %94 : vector<16x32xf32>
    %97 = arith.mulf %91, %96 : vector<16x32xf32>
    %cst_26 = arith.constant dense<0.000000e+00> : vector<2x1xf32>
    %98 = tpu.matmul %43, %1, %cst_26 {dimension_numbers = #tpu.dot_dimension_numbers<[1], [0], [0], [1], [0, 0, 1, 1], [], []>} : vector<2x16xf32>, vector<16x1xf32>, vector<2x1xf32> -> vector<2x1xf32>
    %cst_27 = arith.constant 9.99999997E-7 : f32
    %99 = vector.broadcast %cst_27 : f32 to vector<2x1xf32>
    %100 = arith.maximumf %98, %99 : vector<2x1xf32>
    %101 = tpu.reciprocal %100 : vector<2x1xf32> -> vector<2x1xf32>
    %102 = vector.broadcast %1 : vector<16x1xf32> to vector<16x32xf32>
    %103 = arith.mulf %97, %102 : vector<16x32xf32>
    %cst_28 = arith.constant dense<0.000000e+00> : vector<2x32xf32>
    %104 = tpu.matmul %43, %103, %cst_28 {dimension_numbers = #tpu.dot_dimension_numbers<[1], [0], [0], [1], [0, 0, 1, 1], [], []>} : vector<2x16xf32>, vector<16x32xf32>, vector<2x32xf32> -> vector<2x32xf32>
    %105 = vector.broadcast %101 : vector<2x1xf32> to vector<2x32xf32>
    %106 = arith.mulf %104, %105 : vector<2x32xf32>
    %cst_29 = arith.constant dense<0.000000e+00> : vector<2xf32>
    %107 = vector.multi_reduction <add>, %2, %cst_29 [1] : vector<2x32xf32> to vector<2xf32>
    %108 = vector.shape_cast %107 : vector<2xf32> to vector<2x1xf32>
    %cst_30 = arith.constant 3.200000e+01 : f32
    %109 = vector.broadcast %cst_30 : f32 to vector<2x1xf32>
    %110 = arith.divf %108, %109 : vector<2x1xf32>
    %111 = vector.broadcast %110 : vector<2x1xf32> to vector<2x32xf32>
    %112 = arith.subf %2, %111 : vector<2x32xf32>
    %113 = arith.mulf %112, %112 : vector<2x32xf32>
    %cst_31 = arith.constant dense<0.000000e+00> : vector<2xf32>
    %114 = vector.multi_reduction <add>, %113, %cst_31 [1] : vector<2x32xf32> to vector<2xf32>
    %115 = vector.shape_cast %114 : vector<2xf32> to vector<2x1xf32>
    %cst_32 = arith.constant 3.200000e+01 : f32
    %116 = vector.broadcast %cst_32 : f32 to vector<2x1xf32>
    %117 = arith.divf %115, %116 : vector<2x1xf32>
    %118 = vector.broadcast %110 : vector<2x1xf32> to vector<2x32xf32>
    %119 = arith.subf %2, %118 : vector<2x32xf32>
    %cst_33 = arith.constant 9.99999974E-6 : f32
    %120 = vector.broadcast %cst_33 : f32 to vector<2x1xf32>
    %121 = arith.addf %117, %120 : vector<2x1xf32>
    %122 = math.rsqrt %121 : vector<2x1xf32>
    %123 = vector.broadcast %122 : vector<2x1xf32> to vector<2x32xf32>
    %124 = arith.mulf %119, %123 : vector<2x32xf32>
    %125 = vector.broadcast %14 : vector<1x32xf32> to vector<2x32xf32>
    %126 = arith.mulf %124, %125 : vector<2x32xf32>
    %127 = vector.broadcast %15 : vector<1x32xf32> to vector<2x32xf32>
    %128 = arith.addf %126, %127 : vector<2x32xf32>
    %cst_34 = arith.constant dense<0.000000e+00> : vector<2x64xf32>
    %129 = tpu.matmul %128, %6, %cst_34 {dimension_numbers = #tpu.dot_dimension_numbers<[1], [0], [0], [1], [0, 0, 1, 1], [], []>} : vector<2x32xf32>, vector<32x64xf32>, vector<2x64xf32> -> vector<2x64xf32>
    %130 = vector.broadcast %16 : vector<1x64xf32> to vector<2x64xf32>
    %131 = arith.addf %129, %130 : vector<2x64xf32>
    %cst_35 = arith.constant 5.000000e-01 : f32
    %132 = vector.broadcast %cst_35 : f32 to vector<2x64xf32>
    %133 = arith.mulf %132, %131 : vector<2x64xf32>
    %cst_36 = arith.constant 0.707106769 : f32
    %134 = vector.broadcast %cst_36 : f32 to vector<2x64xf32>
    %135 = arith.mulf %131, %134 : vector<2x64xf32>
    %136 = math.erf %135 : vector<2x64xf32>
    %cst_37 = arith.constant 1.000000e+00 : f32
    %137 = vector.broadcast %cst_37 : f32 to vector<2x64xf32>
    %138 = arith.addf %137, %136 : vector<2x64xf32>
    %139 = arith.mulf %133, %138 : vector<2x64xf32>
    %cst_38 = arith.constant dense<0.000000e+00> : vector<2x32xf32>
    %140 = tpu.matmul %139, %7, %cst_38 {dimension_numbers = #tpu.dot_dimension_numbers<[1], [0], [0], [1], [0, 0, 1, 1], [], []>} : vector<2x64xf32>, vector<64x32xf32>, vector<2x32xf32> -> vector<2x32xf32>
    %141 = vector.broadcast %17 : vector<1x32xf32> to vector<2x32xf32>
    %142 = arith.addf %140, %141 : vector<2x32xf32>
    %cst_39 = arith.constant dense<0xFF800000> : vector<2xf32>
    %143 = vector.multi_reduction <maximumf>, %142, %cst_39 [1] : vector<2x32xf32> to vector<2xf32>
    %144 = vector.shape_cast %143 : vector<2xf32> to vector<2x1xf32>
    %145 = vector.broadcast %144 : vector<2x1xf32> to vector<2x32xf32>
    %146 = arith.subf %142, %145 : vector<2x32xf32>
    %147 = math.exp %146 : vector<2x32xf32>
    %cst_40 = arith.constant dense<0.000000e+00> : vector<2xf32>
    %148 = vector.multi_reduction <add>, %147, %cst_40 [1] : vector<2x32xf32> to vector<2xf32>
    %149 = vector.shape_cast %148 : vector<2xf32> to vector<2x1xf32>
    %150 = math.log %149 : vector<2x1xf32>
    %151 = vector.broadcast %150 : vector<2x1xf32> to vector<2x32xf32>
    %152 = arith.subf %146, %151 : vector<2x32xf32>
    %153 = tpu.iota {dimensions = array<i32: 1>} : vector<2x32xi32>
    %c16_i32 = arith.constant 16 : i32
    %154 = vector.broadcast %c16_i32 : i32 to vector<2x32xi32>
    %155 = arith.cmpi slt, %153, %154 : vector<2x32xi32>
    %156 = arith.mulf %106, %152 : vector<2x32xf32>
    %157 = arith.select %155, %152, %156 : vector<2x32xi1>, vector<2x32xf32>
    %cst_41 = arith.constant dense<0.000000e+00> : vector<16x32xf32>
    %158 = tpu.matmul %64, %157, %cst_41 {dimension_numbers = #tpu.dot_dimension_numbers<[1], [0], [0], [1], [0, 0, 1, 1], [], []>} : vector<16x2xf32>, vector<2x32xf32>, vector<16x32xf32> -> vector<16x32xf32>
    %159 = tpu.iota {dimensions = array<i32: 1>} : vector<16x32xi32>
    %c16_i32_42 = arith.constant 16 : i32
    %160 = vector.broadcast %c16_i32_42 : i32 to vector<16x32xi32>
    %161 = arith.cmpi slt, %159, %160 : vector<16x32xi32>
    %cst_43 = arith.constant 1.000000e+00 : f32
    %162 = vector.broadcast %cst_43 : f32 to vector<16x32xf32>
    %163 = arith.select %161, %97, %162 : vector<16x32xi1>, vector<16x32xf32>
    %164 = arith.mulf %163, %158 : vector<16x32xf32>
    %cst_44 = arith.constant dense<0.000000e+00> : vector<16xf32>
    %165 = vector.multi_reduction <add>, %164, %cst_44 [1] : vector<16x32xf32> to vector<16xf32>
    %166 = vector.shape_cast %165 : vector<16xf32> to vector<16x1xf32>
    %cst_45 = arith.constant 3.200000e+01 : f32
    %167 = vector.broadcast %cst_45 : f32 to vector<16x1xf32>
    %168 = arith.divf %166, %167 : vector<16x1xf32>
    %169 = vector.broadcast %168 : vector<16x1xf32> to vector<16x32xf32>
    %170 = arith.subf %164, %169 : vector<16x32xf32>
    %171 = arith.mulf %170, %170 : vector<16x32xf32>
    %cst_46 = arith.constant dense<0.000000e+00> : vector<16xf32>
    %172 = vector.multi_reduction <add>, %171, %cst_46 [1] : vector<16x32xf32> to vector<16xf32>
    %173 = vector.shape_cast %172 : vector<16xf32> to vector<16x1xf32>
    %cst_47 = arith.constant 3.200000e+01 : f32
    %174 = vector.broadcast %cst_47 : f32 to vector<16x1xf32>
    %175 = arith.divf %173, %174 : vector<16x1xf32>
    %176 = vector.broadcast %168 : vector<16x1xf32> to vector<16x32xf32>
    %177 = arith.subf %164, %176 : vector<16x32xf32>
    %cst_48 = arith.constant 9.99999974E-6 : f32
    %178 = vector.broadcast %cst_48 : f32 to vector<16x1xf32>
    %179 = arith.addf %175, %178 : vector<16x1xf32>
    %180 = math.rsqrt %179 : vector<16x1xf32>
    %181 = vector.broadcast %180 : vector<16x1xf32> to vector<16x32xf32>
    %182 = arith.mulf %177, %181 : vector<16x32xf32>
    %183 = vector.broadcast %18 : vector<1x32xf32> to vector<16x32xf32>
    %184 = arith.mulf %182, %183 : vector<16x32xf32>
    %185 = vector.broadcast %19 : vector<1x32xf32> to vector<16x32xf32>
    %186 = arith.addf %184, %185 : vector<16x32xf32>
    %cst_49 = arith.constant dense<0.000000e+00> : vector<16x16xf32>
    %187 = tpu.matmul %186, %8, %cst_49 {dimension_numbers = #tpu.dot_dimension_numbers<[1], [0], [0], [1], [0, 0, 1, 1], [], []>} : vector<16x32xf32>, vector<32x16xf32>, vector<16x16xf32> -> vector<16x16xf32>
    %188 = vector.broadcast %20 : vector<1x16xf32> to vector<16x16xf32>
    %189 = arith.addf %187, %188 : vector<16x16xf32>
    %cst_50 = arith.constant 5.000000e-01 : f32
    %190 = vector.broadcast %cst_50 : f32 to vector<16x16xf32>
    %191 = arith.mulf %190, %189 : vector<16x16xf32>
    %cst_51 = arith.constant 0.707106769 : f32
    %192 = vector.broadcast %cst_51 : f32 to vector<16x16xf32>
    %193 = arith.mulf %189, %192 : vector<16x16xf32>
    %194 = math.erf %193 : vector<16x16xf32>
    %cst_52 = arith.constant 1.000000e+00 : f32
    %195 = vector.broadcast %cst_52 : f32 to vector<16x16xf32>
    %196 = arith.addf %195, %194 : vector<16x16xf32>
    %197 = arith.mulf %191, %196 : vector<16x16xf32>
    %cst_53 = arith.constant dense<0.000000e+00> : vector<16x8xf32>
    %198 = tpu.matmul %197, %9, %cst_53 {dimension_numbers = #tpu.dot_dimension_numbers<[1], [0], [0], [1], [0, 0, 1, 1], [], []>} : vector<16x16xf32>, vector<16x8xf32>, vector<16x8xf32> -> vector<16x8xf32>
    %199 = vector.broadcast %21 : vector<1x8xf32> to vector<16x8xf32>
    %200 = arith.addf %198, %199 : vector<16x8xf32>
    %cst_54 = arith.constant 5.000000e-01 : f32
    %201 = vector.broadcast %cst_54 : f32 to vector<16x8xf32>
    %202 = arith.mulf %201, %200 : vector<16x8xf32>
    %cst_55 = arith.constant 0.707106769 : f32
    %203 = vector.broadcast %cst_55 : f32 to vector<16x8xf32>
    %204 = arith.mulf %200, %203 : vector<16x8xf32>
    %205 = math.erf %204 : vector<16x8xf32>
    %cst_56 = arith.constant 1.000000e+00 : f32
    %206 = vector.broadcast %cst_56 : f32 to vector<16x8xf32>
    %207 = arith.addf %206, %205 : vector<16x8xf32>
    %208 = arith.mulf %202, %207 : vector<16x8xf32>
    %cst_57 = arith.constant dense<0.000000e+00> : vector<16x1xf32>
    %209 = tpu.matmul %208, %10, %cst_57 {dimension_numbers = #tpu.dot_dimension_numbers<[1], [0], [0], [1], [0, 0, 1, 1], [], []>} : vector<16x8xf32>, vector<8x1xf32>, vector<16x1xf32> -> vector<16x1xf32>
    %210 = vector.broadcast %22 : vector<1x1xf32> to vector<16x1xf32>
    %211 = arith.addf %209, %210 : vector<16x1xf32>
    %cst_58 = arith.constant 0.000000e+00 : f32
    %212 = vector.broadcast %cst_58 : f32 to vector<16x1xf32>
    %213 = arith.subf %212, %211 : vector<16x1xf32>
    %214 = math.exp %213 : vector<16x1xf32>
    %cst_59 = arith.constant 1.000000e+00 : f32
    %215 = vector.broadcast %cst_59 : f32 to vector<16x1xf32>
    %216 = arith.addf %215, %214 : vector<16x1xf32>
    %217 = tpu.reciprocal %216 : vector<16x1xf32> -> vector<16x1xf32>
    %c0_60 = arith.constant 0 : index
    %c0_61 = arith.constant 0 : index
    %218 = vector.load %arg5[%c0_60, %c0_61] : memref<16x1xf32, #tpu.memory_space<vmem>>, vector<16x1xf32>
    tpu.vector_store %arg5[%c0_60, %c0_61], %217 {strides = array<i32>} : memref<16x1xf32, #tpu.memory_space<vmem>>, vector<16x1xf32>,
    return
  }
}

</mosaic_0001>

<bundles_post_ra>
// kernel: sub.3
= control target key start
LH: loop header
LB: loop body
LE: loop exit
PB: predicated region body
PF: predicated region fallthrough
CT: control target
= control target key end

     0   :  { %s34_s0 = inlined_call_operand.vmem [shape: f32[8,1], index: 0, kind: input, shape index: {}]   ;;  %s35_s1 = inlined_call_operand.vmem [shape: f32[8,1], index: 1, kind: input, shape index: {}]   ;;  %s36_s2 = inlined_call_operand.vmem [shape: f32[8,1], index: 2, kind: output, shape index: {}]  }
   0x1   :  { %v3_v0 = vld [vmem:[%s34_s0] sm:$0xff] }
   0x2   :  { %v4_v1 = vld [vmem:[%s35_s1] sm:$0xff] }
   0x3   :  { %v7_v2 = vsub.f32 %v3_v0, %v4_v1 }
   0x5   :  { %9 = vst [vmem:[%s36_s2] sm:$0xff] %v7_v2 }

// kernel: _forward_impl.1
= control target key start
LH: loop header
LB: loop body
LE: loop exit
PB: predicated region body
PF: predicated region fallthrough
CT: control target
= control target key end

     0   :  { %vm100_vm0 = vcmask 261120   ;;  %vm399_vm1 = vcmask 254976   ;;  %v1250_v27 = vmov 0.0|0.0   ;;  %vm1251_vm2 = vmmov 0   ;;  %s1480_s0 = inlined_call_operand.vmem [shape: f32[16,32], index: 0, kind: input, shape index: {}]   ;;  %s1481_s2 = inlined_call_operand.vmem [shape: f32[2,32], index: 2, kind: input, shape index: {}]   ;;  %s1482_s3 = inlined_call_operand.vmem [shape: f32[184,64], index: 3, kind: input, shape index: {}]   ;;  %s1483_s1 = inlined_call_operand.vmem [shape: f32[16,1], index: 1, kind: input, shape index: {}]   ;;  %s1484_s4 = inlined_call_operand.vmem [shape: f32[12,64], index: 4, kind: input, shape index: {}]   ;;  %s1485_s5 = inlined_call_operand.vmem [shape: f32[16,1], index: 5, kind: output, shape index: {}]  }
   0x1   :  { %v20_v0 = vld [vmem:[%s1480_s0] sm:$0xff]  ;;  %v21_v2 = vld [vmem:[%s1480_s0 + $0x8] sm:$0xff]  ;;  %v27_v24 = vld [vmem:[%s1482_s3 + $0x10] sm:$0xff]  ;;  %1170 = vmatprep.subr.bf16.mxu1 %v1250_v27  ;;  %v1252_v28 = vmov 0.0   ;;  %v1253_v29 = vmov 0   ;;  %v50_v34 = vlaneseq  ;;  %vm235_vm4 = vcmask 130048  }
   0x2   :  { %v24_v1 = vld [vmem:[%s1481_s2] sm:$0x3]  ;;  %v101_v3 = vsel %vm100_vm0, %v20_v0, 0.0  ;;  %v104_v5 = vsel %vm100_vm0, %v21_v2, 0.0  ;;  %v26_v22 = vld [vmem:[%s1482_s3 + $0x8] sm:$0xff]  ;;  %v28_v25 = vld [vmem:[%s1482_s3 + $0x18] sm:$0xff]  ;;  %1094 = vmatprep.mubr.msk.f32.mxu1 %vm1251_vm2, %v1252_v28  ;;  %1211 = vset.pattern.permute.xlu1 %v1253_v29 }
   0x3   :  { %v400_v4 = vsel %vm399_vm1, %v24_v1, 0.0  ;;  %102 = vadd.xlane.f32.xlu0 %v101_v3  ;;  %v25_v21 = vld [vmem:[%s1482_s3] sm:$0xff]  ;;  %v1166_v26 = vpack.c.bf16 %v28_v25, %v27_v24  ;;  %v23_v30 = vld [vmem:[%s1483_s1 + $0x8] sm:$0xff]  ;;  %v1325_v40 = vshrl.u32 %v50_v34, 7  ;;  %v31_v62 = vld [vmem:[%s1482_s3 + $0x30] sm:$0xff]  ;;  %vm509_vm5 = vcmask 523264  }
   0x4   :  { %401 = vadd.xlane.f32.xlu1 %v400_v4  ;;  %v1162_v23 = vpack.c.bf16 %v26_v22, %v25_v21  ;;  %1210 = vset.pattern.permute.xlu0 %v1253_v29  ;;  %v22_v31 = vld [vmem:[%s1483_s1] sm:$0xff]  ;;  %v30_v55 = vld [vmem:[%s1482_s3 + $0x28] sm:$0xff]  ;;  %v32_v63 = vld [vmem:[%s1482_s3 + $0x38] sm:$0xff]  ;;  %vm598_vm7 = vcmask 15360   ;;  %vm605_vm9 = vcmask 1041408   ;;  %vm920_vm11 = vcmask 64512  }
   0x5   :  { %v130_v43 = vsub.s32 0, %v1325_v40  ;;  %v1331_v44 = vld [vmem:[%s1484_s4] sm:$0xff]  ;;  %v136_v45 = vsub.s32 1, %v1325_v40  ;;  %v415_v56 = vsub.s32 3, %v1325_v40  ;;  %vm1012_vm12 = vcmask 7168  }
   0x6   :  { %1163 = vmatprep.subr.bf16.mxu0 %v1162_v23  ;;  %v29_v54 = vld [vmem:[%s1482_s3 + $0x20] sm:$0xff] }
   0x7   :  { %105 = vadd.xlane.f32.xlu0 %v104_v5  ;;  %1165 = vmatpush3.bf16.msra.mxu0 %v1162_v23  ;;  %v131_v46 = vrot.slane %v1331_v44, %v130_v43  ;;  %v137_v49 = vrot.slane %v1331_v44, %v136_v45  ;;  %v1177_v59 = vpack.c.bf16 %v30_v55, %v29_v54 }
   0x8   :  { %1167 = vmatprep.subr.bf16.mxu0 %v1166_v26 }
   0xb   :  { %1169 = vmatpush3.bf16.msra.mxu0 %v1166_v26 }
   0xc   :  { %1176 = vmatprep.subr.bf16.mxu0 %v1250_v27 }
  0x90   :  { %v103_v6 = vpop.xlane.xlu0 %102 }
  0x91   :  { %v402_v7 = vpop.xlane.xlu1 %401  ;;  %v108_v8 = vmul.f32 0.03125, %v103_v6  ;;  %v1365_v6 = vand.u32 127, %v50_v34 }
  0x92   :  { %v403_v9 = vmul.f32 0.03125, %v402_v7  ;;  %v1171_v7 = vpack.c.bf16 %v23_v30, %v22_v31 }
  0x93   :  { %v110_v10 = vsub.f32 %v20_v0, %v108_v8  ;;  %v416_v0 = vrot.slane %v1331_v44, %v415_v56  ;;  %v56_v8 = vand.u32 1, %v1365_v6  ;;  %vm595_vm10 = vcmp.lt.s32.totalorder %v1365_v6, 16 }
  0x94   :  { %v1296_v11 = vsub.f32 %v24_v1, %v403_v9  ;;  %v106_v12 = vpop.xlane.xlu0 %105  ;;  %v420_v1 = vsub.s32 4, %v1325_v40  ;;  %1172 = vmatpush3.bf16.msra.mxu1 %v1171_v7 }
  0x95   :  { %v109_v13 = vmul.f32 0.03125, %v106_v12  ;;  %v112_v14 = vmul.f32 %v110_v10, %v110_v10  ;;  %vm66_vm3 = vcmp.eq.s32.totalorder %v56_v8, %v1325_v40  ;;  %1173 = vmatprep.subr.bf16.mxu1 %v1250_v27 }
  0x96   :  { %v405_v15 = vmul.f32 %v1296_v11, %v1296_v11  ;;  %v421_v4 = vrot.slane %v1331_v44, %v420_v1  ;;  %v1019_v9 = vsel %vm66_vm3, 1.0, %v1252_v28 }
  0x97   :  { %v111_v16 = vsub.f32 %v21_v2, %v109_v13  ;;  %v114_v17 = vsel %vm100_vm0, %v112_v14, 0.0  ;;  %v1180_v2 = vpack.c.bf16 %v32_v63, %v31_v62  ;;  %1095 = vmatmul.mubr.msk.f32.vlgmr.msra.gmra.mrb[0].mxu1 %vm235_vm4, %v1019_v9 }
  0x98   :  { %115 = vadd.xlane.f32.xlu1 %v114_v17  ;;  %v406_v18 = vsel %vm399_vm1, %v405_v15, 0.0  ;;  %1101 = vmatprep.mubr.msk.f32.mxu1 %vm1251_vm2, %v1252_v28 }
  0x99   :  { %v113_v19 = vmul.f32 %v111_v16, %v111_v16 }
  0x9b   :  { %v117_v20 = vsel %vm100_vm0, %v113_v19, 0.0  ;;  %v425_v19 = vsub.s32 5, %v1325_v40 }
  0x9c   :  { %407 = vadd.xlane.f32.xlu1 %v406_v18  ;;  %118 = vadd.xlane.f32.xlu0 %v117_v20 }
  0x9d   :  { %v426_v21 = vrot.slane %v1331_v44, %v425_v19 }
  0xad   :  { %318 = vperm.xlu1 %1211, %v23_v30  }
  0xb2   :  { %313 = vperm.xlu0 %1210, %v22_v31  }
 0x125   :  { %v116_v32 = vpop.xlane.xlu1 %115 }
 0x126   :  { %v120_v33 = vmul.f32 0.03125, %v116_v32 }
 0x128   :  { %v122_v35 = vadd.f32 1e-05, %v120_v33 }
 0x129   :  { %v408_v36 = vpop.xlane.xlu1 %407  ;;  %v119_v37 = vpop.xlane.xlu0 %118 }
 0x12a   :  { %1212 = vrsqrt.f32 %v122_v35  ;;  %v409_v38 = vmul.f32 0.03125, %v408_v36  ;;  %v121_v39 = vmul.f32 0.03125, %v119_v37 }
 0x12c   :  { %v123_v41 = vadd.f32 1e-05, %v121_v39  ;;  %v410_v42 = vadd.f32 1e-05, %v409_v38  ;;  %v33_v38 = vld [vmem:[%s1482_s3 + $0x40] sm:$0xff]  ;;  %v34_v39 = vld [vmem:[%s1482_s3 + $0x48] sm:$0xff] }
 0x12d   :  { %v319_v30 = vpop.permute.xlu1 %318 }
 0x12e   :  { %1214 = vrsqrt.f32 %v123_v41 }
 0x12f   :  { %1216 = vrsqrt.f32 %v410_v42  ;;  %v1183_v42 = vpack.c.bf16 %v34_v39, %v33_v38 }
 0x131   :  { %v314_v33 = vpop.permute.xlu0 %313 }
 0x134   :  { %v1213_v47 = vpop.eup %1212 }
 0x135   :  { %v126_v48 = vmul.f32 %v1213_v47, %v110_v10  ;;  %v142_v10 = vsub.s32 2, %v1325_v40  ;;  %v36_v47 = vld [vmem:[%s1482_s3 + $0x58] sm:$0xff] }
 0x137   :  { %v132_v50 = vmul.f32 %v131_v46, %v126_v48 }
 0x138   :  { %v1215_v51 = vpop.eup %1214 }
 0x139   :  { %v138_v52 = vadd.f32 %v137_v49, %v132_v50  ;;  %v127_v53 = vmul.f32 %v1215_v51, %v111_v16  ;;  %v1217_v57 = vpop.eup %1216  ;;  %v38_v50 = vld [vmem:[%s1482_s3 + $0x68] sm:$0xff] }
 0x13a   :  { %v412_v60 = vmul.f32 %v1217_v57, %v1296_v11  ;;  %v143_v11 = vrot.slane %v1331_v44, %v142_v10 }
 0x13b   :  { %1087 = vmatprep.mubr.msk.f32.mxu0 %vm100_vm0, %v138_v52  ;;  %v133_v58 = vmul.f32 %v131_v46, %v127_v53  ;;  %v35_v46 = vld [vmem:[%s1482_s3 + $0x50] sm:$0xff]  ;;  %v40_v53 = vld [vmem:[%s1482_s3 + $0x78] sm:$0xff] }
 0x13c   :  { %v417_v3 = vmul.f32 %v416_v0, %v412_v60  ;;  %v1186_v48 = vpack.c.bf16 %v36_v47, %v35_v46  ;;  %v39_v52 = vld [vmem:[%s1482_s3 + $0x70] sm:$0xff]  ;;  %v507_v0 = vsub.s32 6, %v1325_v40 }
 0x13d   :  { %v139_v61 = vadd.f32 %v137_v49, %v133_v58  ;;  %v37_v49 = vld [vmem:[%s1482_s3 + $0x60] sm:$0xff]  ;;  %v1192_v55 = vpack.c.bf16 %v40_v53, %v39_v52  ;;  %v43_v52 = vld [vmem:[%s1482_s3 + $0x90] sm:$0xff]  ;;  %v44_v53 = vld [vmem:[%s1482_s3 + $0x98] sm:$0xff] }
 0x13e   :  { %v422_v5 = vadd.f32 %v421_v4, %v417_v3  ;;  %v1189_v51 = vpack.c.bf16 %v38_v50, %v37_v49  ;;  %v508_v1 = vrot.slane %v1331_v44, %v507_v0  ;;  %v41_v49 = vld [vmem:[%s1482_s3 + $0x80] sm:$0xff]  ;;  %v42_v50 = vld [vmem:[%s1482_s3 + $0x88] sm:$0xff] }
 0x13f   :  { %1088 = vmatmul.mubr.msk.f32.vlgmr.msra.gmra.mrb[0].mxu0 %vm100_vm0, %v139_v61 }
 0x140   :  { %1178 = vmatpush3.bf16.msra.mxu0 %v1177_v59  ;;  %1112 = vmatprep.mubr.msk.f32.mxu0 %vm1251_vm2, %v1252_v28 }
 0x141   :  { %1179 = vmatprep.subr.bf16.mxu0 %v1250_v27 }
 0x144   :  { %1181 = vmatpush3.bf16.msra.mxu0 %v1180_v2 }
 0x147   :  { %1113 = vmatmul.mubr.msk.f32.vlgmr.msra.gmra.mrb[2].mxu0 %vm100_vm0, %v422_v5 }
 0x16a   :  { %v305_v60 = vpop.f32.mrb[0].mxu1 }
 0x16b   :  { %v1096_v61 = vpop.f32.mrb[1].mxu1 }
 0x212   :  { %v1089_v12 = vpop.f32.mrb[0].mxu0 }
 0x213   :  { %v222_v13 = vadd.f32 %v1089_v12, %v143_v11  ;;  %v216_v14 = vpop.f32.mrb[1].mxu0 }
 0x214   :  { %v217_v15 = vadd.f32 %v216_v14, %v143_v11  ;;  %v74_v14 = vand.u32 1, %v1325_v40 }
 0x215   :  { %v228_v16 = vmul.f32 0.70710677, %v222_v13  ;;  %v226_v24 = vmul.f32 0.5, %v222_v13 }
 0x216   :  { %v227_v17 = vmul.f32 0.70710677, %v217_v15  ;;  %v225_v26 = vmul.f32 0.5, %v217_v15  ;;  %vm94_vm6 = vcmp.eq.s32.totalorder %v74_v14, %v1365_v6 }
 0x217   :  { %1218 = verf.f32 %v228_v16  ;;  %v1020_v15 = vsel %vm94_vm6, 1.0, %v1252_v28 }
 0x218   :  { %1220 = verf.f32 %v227_v17  ;;  %1136 = vmatprep.mubr.msk.f32.mxu0 %vm598_vm7, %v1020_v15  ;;  %v69_v17 = vadd.s32 8, %v1325_v40 }
 0x21a   :  { %v496_v18 = vpop.f32.mrb[2].mxu0 }
 0x21b   :  { %v1114_v20 = vpop.f32.mrb[3].mxu0  ;;  %v497_v29 = vadd.f32 %v496_v18, %v426_v21 }
 0x21c   :  { %v81_v20 = vand.u32 1, %v69_v17 }
 0x21d   :  { %v501_v36 = vmul.f32 0.70710677, %v497_v29  ;;  %v500_v58 = vmul.f32 0.5, %v497_v29 }
 0x21e   :  { %vm95_vm8 = vcmp.eq.s32.totalorder %v81_v20, %v1365_v6 }
 0x21f   :  { %1222 = verf.f32 %v501_v36 }
 0x221   :  { %v1219_v22 = vpop.eup %1218 }
 0x222   :  { %v1221_v23 = vpop.eup %1220  ;;  %v232_v25 = vadd.f32 1.0, %v1219_v22 }
 0x223   :  { %v231_v31 = vadd.f32 1.0, %v1221_v23 }
 0x224   :  { %v1380_v32 = vmul.f32 %v232_v25, %v226_v24 }
 0x225   :  { %v1382_v34 = vmul.f32 %v231_v31, %v225_v26  ;;  %v1021_v26 = vsel %vm95_vm8, 1.0, %v1252_v28 }
 0x226   :  { %v322_v35 = vmul.f32 %v319_v30, %v1380_v32  ;;  %v685_v30 = vsel %vm595_vm10, %v1380_v32, 1.0 }
 0x227   :  { %v321_v37 = vmul.f32 %v314_v33, %v1382_v34 }
 0x229   :  { %v1174_v41 = vpack.c.bf16 %v322_v35, %v321_v37  ;;  %v1223_v54 = vpop.eup %1222  ;;  %v684_v35 = vsel %vm595_vm10, %v1382_v34, 1.0 }
 0x22a   :  { %v503_v57 = vadd.f32 1.0, %v1223_v54  ;;  %v1198_v54 = vpack.c.bf16 %v44_v53, %v43_v52 }
 0x22b   :  { %1175 = vmatpush3.bf16.msra.mxu1 %v1174_v41 }
 0x22c   :  { %1182 = vmatprep.subr.bf16.mxu1 %v1250_v27  ;;  %v504_v59 = vmul.f32 %v503_v57, %v500_v58 }
 0x22e   :  { %1102 = vmatmul.mubr.msk.f32.vlgmr.msra.gmra.mrb[2].mxu1 %vm235_vm4, %v1019_v9 }
 0x22f   :  { %1184 = vmatpush3.bf16.msra.mxu1 %v1183_v42  ;;  %1131 = vmatprep.mubr.msk.f32.mxu1 %vm1251_vm2, %v1252_v28 }
 0x230   :  { %1185 = vmatprep.subr.bf16.mxu1 %v1250_v27 }
 0x233   :  { %1187 = vmatpush3.bf16.msra.mxu1 %v1186_v48 }
 0x234   :  { %1188 = vmatprep.subr.bf16.mxu1 %v1250_v27 }
 0x237   :  { %1190 = vmatpush3.bf16.msra.mxu1 %v1189_v51  ;;  %v1194_v51 = vpack.c.bf16 %v42_v50, %v41_v49 }
 0x238   :  { %1191 = vmatprep.subr.bf16.mxu1 %v1250_v27  ;;  %v309_v27 = vmax.f32 %v305_v60, 1e-06 }
 0x23a   :  { %1224 = vrcp.f32 %v309_v27 }
 0x23b   :  { %1193 = vmatpush3.bf16.msra.mxu1 %v1192_v55 }
 0x23e   :  { %1132 = vmatmul.mubr.msk.f32.vlgmr.msra.gmra.mrb[4].mxu1 %vm509_vm5, %v504_v59 }
 0x244   :  { %v1225_v7 = vpop.eup %1224 }
 0x301   :  { %v389_v62 = vpop.f32.mrb[2].mxu1 }
 0x302   :  { %v1103_v63 = vpop.f32.mrb[3].mxu1 }
 0x303   :  { %v49_v63 = vld [vmem:[%s1484_s4 + $0x8] sm:$0xf] }
 0x311   :  { %v579_v2 = vpop.f32.mrb[4].mxu1 }
 0x312   :  { %v580_v3 = vadd.f32 %v579_v2, %v508_v1  ;;  %v1133_v4 = vpop.f32.mrb[5].mxu1 }
 0x314   :  { %v583_v5 = vsel %vm399_vm1, %v580_v3, -inf }
 0x315   :  { %584 = vmax.xlane.f32.xlu1 %v583_v5 }
 0x326   :  { %395 = vperm.xlu1 %1211, %v1225_v7  }
 0x3a2   :  { %v585_v8 = vpop.xlane.xlu1 %584 }
 0x3a3   :  { %v586_v9 = vsub.f32 %v580_v3, %v585_v8  ;;  %v723_v3 = vrot.slane %v49_v63, %v130_v43  ;;  %v729_v43 = vrot.slane %v49_v63, %v136_v45  ;;  %v47_v45 = vld [vmem:[%s1482_s3 + $0xb0] sm:$0xff] }
 0x3a5   :  { %v587_v11 = vmul.f32 1.442695, %v586_v9 }
 0x3a6   :  { %v396_v19 = vpop.permute.xlu1 %395 }
 0x3a7   :  { %1226 = vpow2.f32 %v587_v11  ;;  %v398_v22 = vmul.f32 %v396_v19, %v389_v62  ;;  %v716_v62 = vsub.s32 7, %v1325_v40  ;;  %v45_v11 = vld [vmem:[%s1482_s3 + $0xa0] sm:$0xff] }
 0x3a9   :  { %v717_v0 = vrot.slane %v1331_v44, %v716_v62  ;;  %v46_v44 = vld [vmem:[%s1482_s3 + $0xa8] sm:$0xff] }
 0x3b1   :  { %v1227_v12 = vpop.eup %1226 }
 0x3b2   :  { %v589_v13 = vsel %vm399_vm1, %v1227_v12, 0.0  ;;  %v1202_v12 = vpack.c.bf16 %v46_v44, %v45_v11 }
 0x3b3   :  { %590 = vadd.xlane.f32.xlu0 %v589_v13 }
 0x3b4   :  { %1203 = vmatprep.subr.bf16.mxu1 %v1202_v12 }
 0x3b5   :  { %1205 = vmatpush3.bf16.msra.mxu1 %v1202_v12 }
 0x440   :  { %v591_v16 = vpop.xlane.xlu0 %590 }
 0x441   :  { %1228 = vlog2.f32 %v591_v16 }
 0x44b   :  { %v1229_v18 = vpop.eup %1228 }
 0x44c   :  { %v593_v21 = vmul.f32 0.6931472, %v1229_v18 }
 0x44e   :  { %v594_v23 = vsub.f32 %v586_v9, %v593_v21 }
 0x450   :  { %v596_v24 = vmul.f32 %v594_v23, %v398_v22 }
 0x452   :  { %v597_v25 = vsel %vm595_vm10, %v594_v23, %v596_v24 }
 0x453   :  { %1134 = vmatprep.subr.msk.mxu0 %vm605_vm9, %v597_v25 }
 0x454   :  { %1135 = vmatpush3.msk.msra.mxu0 %vm605_vm9, %v597_v25 }
 0x455   :  { %1137 = vmatmul.mubr.msk.f32.vlgmr.msra.gmra.mrb[4].mxu0 %vm598_vm7, %v1021_v26  ;;  %1195 = vmatprep.subr.bf16.mxu0 %v1194_v51 }
 0x456   :  { %1197 = vmatpush3.bf16.msra.mxu0 %v1194_v51 }
 0x457   :  { %1199 = vmatprep.subr.bf16.mxu0 %v1198_v54 }
 0x45a   :  { %1201 = vmatpush3.bf16.msra.mxu0 %v1198_v54 }
 0x45b   :  { %1157 = vmatprep.subr.mxu0 %v47_v45 }
 0x528   :  { %v1138_v29 = vpop.f32.mrb[4].mxu0 }
 0x529   :  { %v687_v31 = vmul.f32 %v1138_v29, %v685_v30  ;;  %v675_v33 = vpop.f32.mrb[5].mxu0  ;;  %v824_v29 = vrot.slane %v49_v63, %v142_v10  ;;  %v919_v10 = vrot.slane %v49_v63, %v415_v56 }
 0x52a   :  { %v686_v36 = vmul.f32 %v684_v35, %v675_v33 }
 0x52b   :  { %v691_v37 = vsel %vm100_vm0, %v687_v31, 0.0 }
 0x52c   :  { %692 = vadd.xlane.f32.xlu0 %v691_v37  ;;  %v688_v6 = vsel %vm100_vm0, %v686_v36, 0.0 }
 0x52d   :  { %689 = vadd.xlane.f32.xlu1 %v688_v6 }
 0x5b9   :  { %v693_v38 = vpop.xlane.xlu0 %692 }
 0x5ba   :  { %v695_v28 = vmul.f32 0.03125, %v693_v38  ;;  %v690_v39 = vpop.xlane.xlu1 %689 }
 0x5bb   :  { %v694_v41 = vmul.f32 0.03125, %v690_v39 }
 0x5bc   :  { %v697_v42 = vsub.f32 %v687_v31, %v695_v28 }
 0x5bd   :  { %v696_v46 = vsub.f32 %v686_v36, %v694_v41 }
 0x5be   :  { %v699_v48 = vmul.f32 %v697_v42, %v697_v42 }
 0x5bf   :  { %v698_v47 = vmul.f32 %v696_v46, %v696_v46 }
 0x5c0   :  { %v703_v34 = vsel %vm100_vm0, %v699_v48, 0.0 }
 0x5c1   :  { %v700_v32 = vsel %vm100_vm0, %v698_v47, 0.0 }
 0x5c2   :  { %701 = vadd.xlane.f32.xlu0 %v700_v32 }
 0x5c6   :  { %704 = vadd.xlane.f32.xlu0 %v703_v34 }
 0x64f   :  { %v702_v55 = vpop.xlane.xlu0 %701 }
 0x650   :  { %v706_v57 = vmul.f32 0.03125, %v702_v55 }
 0x652   :  { %v708_v58 = vadd.f32 1e-05, %v706_v57 }
 0x653   :  { %v705_v59 = vpop.xlane.xlu0 %704 }
 0x654   :  { %1230 = vrsqrt.f32 %v708_v58  ;;  %v707_v60 = vmul.f32 0.03125, %v705_v59 }
 0x656   :  { %v709_v61 = vadd.f32 1e-05, %v707_v60 }
 0x658   :  { %1232 = vrsqrt.f32 %v709_v61 }
 0x65e   :  { %v1231_v1 = vpop.eup %1230 }
 0x65f   :  { %v712_v2 = vmul.f32 %v1231_v1, %v696_v46 }
 0x661   :  { %v718_v4 = vmul.f32 %v717_v0, %v712_v2 }
 0x662   :  { %v1233_v5 = vpop.eup %1232 }
 0x663   :  { %v713_v27 = vmul.f32 %v1233_v5, %v697_v42  ;;  %v724_v7 = vadd.f32 %v723_v3, %v718_v4 }
 0x665   :  { %v719_v8 = vmul.f32 %v717_v0, %v713_v27  ;;  %1147 = vmatprep.mubr.msk.f32.mxu0 %vm100_vm0, %v724_v7 }
 0x667   :  { %v725_v9 = vadd.f32 %v723_v3, %v719_v8 }
 0x669   :  { %1148 = vmatmul.mubr.msk.f32.vlgmr.msra.gmra.mrb[6].mxu0 %vm100_vm0, %v725_v9 }
 0x66a   :  { %1158 = vmatpush3.msra.mxu0 %v47_v45 }
 0x73c   :  { %v1149_v13 = vpop.f32.mrb[6].mxu0 }
 0x73d   :  { %v808_v14 = vadd.f32 %v1149_v13, %v729_v43  ;;  %v802_v15 = vpop.f32.mrb[7].mxu0 }
 0x73e   :  { %v803_v16 = vadd.f32 %v802_v15, %v729_v43 }
 0x73f   :  { %v814_v17 = vmul.f32 0.70710677, %v808_v14  ;;  %v812_v24 = vmul.f32 0.5, %v808_v14 }
 0x740   :  { %v813_v18 = vmul.f32 0.70710677, %v803_v16  ;;  %v811_v22 = vmul.f32 0.5, %v803_v16 }
 0x741   :  { %1234 = verf.f32 %v814_v17 }
 0x742   :  { %1236 = verf.f32 %v813_v18 }
 0x74b   :  { %v1235_v19 = vpop.eup %1234 }
 0x74c   :  { %v1237_v20 = vpop.eup %1236  ;;  %v818_v21 = vadd.f32 1.0, %v1235_v19 }
 0x74d   :  { %v817_v23 = vadd.f32 1.0, %v1237_v20 }
 0x74e   :  { %v820_v26 = vmul.f32 %v818_v21, %v812_v24 }
 0x74f   :  { %v819_v25 = vmul.f32 %v817_v23, %v811_v22 }
 0x751   :  { %1154 = vmatprep.mubr.msk.f32.mxu1 %vm235_vm4, %v819_v25 }
 0x752   :  { %1155 = vmatmul.mubr.msk.f32.vlgmr.msra.gmra.mrb[6].mxu1 %vm235_vm4, %v820_v26 }
 0x825   :  { %v1156_v30 = vpop.f32.mrb[6].mxu1 }
 0x826   :  { %v903_v31 = vadd.f32 %v1156_v30, %v824_v29  ;;  %v897_v33 = vpop.f32.mrb[7].mxu1 }
 0x827   :  { %v898_v35 = vadd.f32 %v897_v33, %v824_v29 }
 0x828   :  { %v909_v36 = vmul.f32 0.70710677, %v903_v31  ;;  %v907_v42 = vmul.f32 0.5, %v903_v31 }
 0x829   :  { %v908_v37 = vmul.f32 0.70710677, %v898_v35  ;;  %v906_v39 = vmul.f32 0.5, %v898_v35 }
 0x82a   :  { %1238 = verf.f32 %v909_v36 }
 0x82b   :  { %1240 = verf.f32 %v908_v37 }
 0x834   :  { %v1239_v6 = vpop.eup %1238 }
 0x835   :  { %v1241_v38 = vpop.eup %1240  ;;  %v913_v28 = vadd.f32 1.0, %v1239_v6 }
 0x836   :  { %v912_v41 = vadd.f32 1.0, %v1241_v38 }
 0x837   :  { %v915_v47 = vmul.f32 %v913_v28, %v907_v42 }
 0x838   :  { %v914_v46 = vmul.f32 %v912_v41, %v906_v39 }
 0x83a   :  { %1159 = vmatprep.mubr.msk.f32.mxu0 %vm920_vm11, %v914_v46 }
 0x83b   :  { %1160 = vmatmul.mubr.msk.f32.vlgmr.msra.gmra.mrb[8].mxu0 %vm920_vm11, %v915_v47 }
 0x90e   :  { %v1161_v32 = vpop.f32.mrb[8].mxu0 }
 0x90f   :  { %v999_v48 = vadd.f32 %v1161_v32, %v919_v10  ;;  %v993_v34 = vpop.f32.mrb[9].mxu0 }
 0x910   :  { %v994_v49 = vadd.f32 %v993_v34, %v919_v10 }
 0x911   :  { %v1003_v50 = vsub.f32 0.0, %v999_v48 }
 0x912   :  { %v1002_v51 = vsub.f32 0.0, %v994_v49 }
 0x913   :  { %v1006_v52 = vmul.f32 1.442695, %v1003_v50 }
 0x914   :  { %v1004_v53 = vmul.f32 1.442695, %v1002_v51 }
 0x915   :  { %1242 = vpow2.f32 %v1006_v52 }
 0x916   :  { %1244 = vpow2.f32 %v1004_v53 }
 0x91f   :  { %v1243_v54 = vpop.eup %1242 }
 0x920   :  { %v1245_v55 = vpop.eup %1244  ;;  %v1009_v57 = vadd.f32 1.0, %v1243_v54 }
 0x921   :  { %v1008_v58 = vadd.f32 1.0, %v1245_v55 }
 0x922   :  { %1246 = vrcp.f32 %v1009_v57 }
 0x923   :  { %1248 = vrcp.f32 %v1008_v58 }
 0x92c   :  { %v1247_v59 = vpop.eup %1246 }
 0x92d   :  { %v1249_v40 = vpop.eup %1248  ;;  %1014 = vst.msk [vmem:[%s1485_s5 + $0x8] sm:$0xff] %vm1012_vm12, %v1247_v59 }
 0x92e   :  { %1013 = vst.msk [vmem:[%s1485_s5] sm:$0xff] %vm1012_vm12, %v1249_v40 }

</bundles_post_ra>
